<compile_context>
chip_gen: v5e
topology: v5e:2x2
jax: 0.10.0
libtpu: 0.0.40
codegen_flags: <defaults>
</compile_context>

<pallas_src>
import jax
import jax.numpy as jnp
from jax.experimental import pallas as pl
from jax.experimental.pallas import tpu as pltpu

T = 8        # token_max_length (small stand-in for 512)
H = 128      # hidden size
VOCAB = 64   # synthetic vocab size
BBLK = 16    # sequences per pooling grid step -> M = BBLK * T = 128 MXU rows


# ----------------------------------------------------------------------------
# Kernel: synthetic BERT layer + attention-mask mean pooling.
#         Two chained MXU matmuls per grid step; lane-dense (BBLK, H) output.
# ----------------------------------------------------------------------------
def bert_pool_kernel(x_ref, pw_ref, w_ref, b_ref, out_ref):
    # x_ref  : (BBLK*T, H)     bf16 embedded tokens (BBLK sequences, flattened)
    # pw_ref : (BBLK, BBLK*T)  f32 block-diagonal normalized mask weights
    # w_ref  : (H, H)          bf16 encoder weight
    # b_ref  : (1, H)          f32 encoder bias
    # out_ref: (BBLK, H)       f32 pooled embeddings (lane-dense)
    h = jnp.tanh(
        jnp.dot(x_ref[...], w_ref[...],
                preferred_element_type=jnp.float32)        # MXU, M = 128
        + b_ref[...])                                      # (BBLK*T, H) f32
    # masked mean as a second MXU matmul (exact 1/count folded into pw)
    out_ref[...] = jnp.dot(pw_ref[...], h,
                           preferred_element_type=jnp.float32)   # (BBLK, H)


def bert_masked_mean(embedded_flat, pool_w, enc_w, enc_b):
    # embedded_flat: (n_seq*T, H) bf16, pool_w: (n_seq, BBLK*T) f32
    n_seq = pool_w.shape[0]
    assert n_seq % BBLK == 0, "caller pads to a multiple of BBLK"
    n_blk = n_seq // BBLK
    return pl.pallas_call(
        bert_pool_kernel,
        out_shape=jax.ShapeDtypeStruct((n_seq, H), jnp.float32),
        grid=(n_blk,),
        in_specs=[
            pl.BlockSpec((BBLK * T, H), lambda i: (i, 0)),
            pl.BlockSpec((BBLK, BBLK * T), lambda i: (i, 0)),
            pl.BlockSpec((H, H), lambda i: (0, 0)),
            pl.BlockSpec((1, H), lambda i: (0, 0)),
        ],
        out_specs=pl.BlockSpec((BBLK, H), lambda i: (i, 0)),
        compiler_params=pltpu.CompilerParams(
            dimension_semantics=("parallel",)),   # 4 steps -> both v7x TCs
    )(embedded_flat, pool_w, enc_w, enc_b)


# ----------------------------------------------------------------------------
# Synthetic score_func: sigmoid(sum(a*b*w) + bias).  Kept in plain jnp so XLA
# fuses it with the slicing/concat glue (no extra kernel launch at these
# shapes -- ~6 KFLOPs total).
# ----------------------------------------------------------------------------
def score_pairs(a, b, score_w, score_b):
    return jax.nn.sigmoid(jnp.sum(a * b * score_w, axis=-1) + score_b[0])


# ----------------------------------------------------------------------------
# Forward pass mirroring BertClassifierReg.forward
# ----------------------------------------------------------------------------
def bert_classifier_reg_forward(params, input_ids, attention_mask,
                                pseudo_input_ids, pseudo_attention_mask,
                                pseudo_score, token_max_length=T):
    input_ids = input_ids.reshape(-1, token_max_length)
    attention_mask = attention_mask.reshape(-1, token_max_length)
    pseudo_input_ids = pseudo_input_ids.reshape(-1, token_max_length)
    pseudo_attention_mask = pseudo_attention_mask.reshape(-1, token_max_length)

    all_ids = jnp.concatenate([input_ids, pseudo_input_ids], axis=0)
    all_mask = jnp.concatenate([attention_mask, pseudo_attention_mask], axis=0)

    # pad sequence count to a multiple of BBLK (padded rows pool to zero)
    n_seq = all_ids.shape[0]
    pad = (-n_seq) % BBLK
    if pad:
        all_ids = jnp.pad(all_ids, ((0, pad), (0, 0)))
        all_mask = jnp.pad(all_mask, ((0, pad), (0, 0)))
    n_pad = n_seq + pad

    # glue: embedding gather (stands in for bert's embedding layer);
    # cast the *gathered* rows to bf16 (scales with tokens, not vocab).
    embedded = params["emb_table"][all_ids].astype(jnp.bfloat16)   # (n_pad,T,H)
    embedded_flat = embedded.reshape(-1, H)                        # (n_pad*T,H)

    # exact masked-mean weights folded into a block-diagonal pooling matrix:
    # row r (= i*BBLK + b) carries mask_norm[r] at columns [b*T, (b+1)*T).
    mask_f = all_mask.astype(jnp.float32)                          # (n_pad, T)
    mask_norm = mask_f / jnp.maximum(mask_f.sum(-1, keepdims=True), 1e-9)
    row_in_blk = jnp.arange(n_pad, dtype=jnp.int32) % BBLK
    onehot = (row_in_blk[:, None] ==
              jnp.arange(BBLK, dtype=jnp.int32)[None, :]).astype(jnp.float32)
    pool_w = (onehot[:, :, None] * mask_norm[:, None, :]
              ).reshape(n_pad, BBLK * T)                           # lane-dense

    # TODO(synk): nn.Dropout(0.0) is defined in __init__ but never applied in
    # the reference forward; nothing to implement.
    emb_all = bert_masked_mean(embedded_flat, pool_w,
                               params["enc_w"], params["enc_b"])[:n_seq]

    B = input_ids.shape[0]
    pseudo_emb = emb_all[B:, :]
    emb = emb_all[:B, :]

    # same slicing semantics as the PyTorch reference
    pos_output = score_pairs(emb[0::2][::2], emb[1::2][::2],
                             params["score_w"], params["score_b"])
    neg_out = score_pairs(emb[0::2][1::2], emb[1::2][1::2],
                          params["score_w"], params["score_b"])
    output = score_pairs(pseudo_emb[::2], pseudo_emb[1::2],
                         params["score_w"], params["score_b"]).reshape(-1)

    pos_loss = -jnp.mean(jnp.log(pos_output + 1e-15))
    neg_loss = -jnp.mean(jnp.log(1.0 - neg_out + 1e-15))
    loss_labeled = pos_loss + neg_loss
    loss_pseudo = jnp.mean((output - pseudo_score) ** 2) * 5.0     # MSE * 5

    return pos_output, neg_out, loss_labeled, loss_pseudo


if __name__ == "__main__":
    key = jax.random.PRNGKey(0)
    (k_emb, k_w, k_b, k_sw, k_ids, k_pids, k_len, k_plen, k_score) = \
        jax.random.split(key, 9)

    # deterministic synthetic parameters (enc_w cast to bf16 once, outside jit)
    params = {
        "emb_table": jax.random.normal(k_emb, (VOCAB, H), jnp.float32) * 0.1,
        "enc_w": (jax.random.normal(k_w, (H, H), jnp.float32) * 0.05
                  ).astype(jnp.bfloat16),
        "enc_b": jax.random.normal(k_b, (1, H), jnp.float32) * 0.01,
        "score_w": jax.random.normal(k_sw, (1, H), jnp.float32) * 0.2,
        "score_b": jnp.zeros((1,), jnp.float32),
    }

    # labeled batch: 32 sequences (-> 8 positive pairs, 8 negative pairs)
    # pseudo batch:  32 sequences (-> 16 pseudo pairs)
    # total 64 sequences = 4 "parallel" pooling grid steps of BBLK=16
    # (>=2 steps per v7x TensorCore; M = 128 MXU rows per matmul)
    B_lab, B_pse = 32, 32
    input_ids = jax.random.randint(k_ids, (B_lab, T), 0, VOCAB, jnp.int32)
    pseudo_input_ids = jax.random.randint(k_pids, (B_pse, T), 0, VOCAB,
                                          jnp.int32)

    lens = jax.random.randint(k_len, (B_lab, 1), 4, T + 1, jnp.int32)
    plens = jax.random.randint(k_plen, (B_pse, 1), 4, T + 1, jnp.int32)
    pos = jnp.arange(T, dtype=jnp.int32)[None, :]
    attention_mask = (pos < lens).astype(jnp.int32)
    pseudo_attention_mask = (pos < plens).astype(jnp.int32)

    pseudo_score = jax.random.uniform(k_score, (B_pse // 2,), jnp.float32)

    fwd = jax.jit(bert_classifier_reg_forward,
                  static_argnames=("token_max_length",))
    pos_output, neg_out, loss_labeled, loss_pseudo = fwd(
        params, input_ids, attention_mask,
        pseudo_input_ids, pseudo_attention_mask, pseudo_score,
        token_max_length=T)

    jax.block_until_ready((pos_output, neg_out, loss_labeled, loss_pseudo))
    assert pos_output.shape == (8,) and neg_out.shape == (8,)
    assert loss_labeled.shape == () and loss_pseudo.shape == ()
    assert bool(jnp.isfinite(loss_labeled)) and bool(jnp.isfinite(loss_pseudo))
    print("KERNEL_OK")
</pallas_src>

<mosaic_0001>
module attributes {stable_mosaic.version = 11 : i64} {
  func.func @bert_pool_kernel(%arg0: i32, %arg1: memref<128x128xbf16, #tpu.memory_space<vmem>>, %arg2: memref<16x128xf32, #tpu.memory_space<vmem>>, %arg3: memref<128x128xbf16, #tpu.memory_space<vmem>>, %arg4: memref<1x128xf32, #tpu.memory_space<vmem>>, %arg5: memref<16x128xf32, #tpu.memory_space<vmem>>) attributes {dimension_semantics = [#tpu.dimension_semantics<parallel>], iteration_bounds = array<i64: 4>, scalar_prefetch = 0 : i64, scratch_operands = 0 : i64, tpu.core_type = #tpu.core_type<tc>, window_params = [{transform_indices = @transform_0, window_bounds = array<i64: 128, 128>}, {transform_indices = @transform_1, window_bounds = array<i64: 16, 128>}, {pipeline_mode = #tpu.pipeline_mode<synchronous>, transform_indices = @transform_2, window_bounds = array<i64: 128, 128>}, {pipeline_mode = #tpu.pipeline_mode<synchronous>, transform_indices = @transform_3, window_bounds = array<i64: 1, 128>}, {transform_indices = @transform_4, window_bounds = array<i64: 16, 128>}]} {
    %c0 = arith.constant 0 : index
    %c0_0 = arith.constant 0 : index
    %0 = vector.load %arg1[%c0, %c0_0] : memref<128x128xbf16, #tpu.memory_space<vmem>>, vector<128x128xbf16>
    %c0_1 = arith.constant 0 : index
    %c0_2 = arith.constant 0 : index
    %1 = vector.load %arg3[%c0_1, %c0_2] : memref<128x128xbf16, #tpu.memory_space<vmem>>, vector<128x128xbf16>
    %cst = arith.constant dense<0.000000e+00> : vector<128x128xf32>
    %2 = tpu.matmul %0, %1, %cst {dimension_numbers = #tpu.dot_dimension_numbers<[1], [0], [0], [1], [0, 0, 1, 1], [], []>} : vector<128x128xbf16>, vector<128x128xbf16>, vector<128x128xf32> -> vector<128x128xf32>
    %c0_3 = arith.constant 0 : index
    %c0_4 = arith.constant 0 : index
    %3 = vector.load %arg4[%c0_3, %c0_4] : memref<1x128xf32, #tpu.memory_space<vmem>>, vector<1x128xf32>
    %4 = vector.broadcast %3 : vector<1x128xf32> to vector<128x128xf32>
    %5 = arith.addf %2, %4 : vector<128x128xf32>
    %6 = math.tanh %5 : vector<128x128xf32>
    %c0_5 = arith.constant 0 : index
    %c0_6 = arith.constant 0 : index
    %7 = vector.load %arg2[%c0_5, %c0_6] : memref<16x128xf32, #tpu.memory_space<vmem>>, vector<16x128xf32>
    %cst_7 = arith.constant dense<0.000000e+00> : vector<16x128xf32>
    %8 = tpu.matmul %7, %6, %cst_7 {dimension_numbers = #tpu.dot_dimension_numbers<[1], [0], [0], [1], [0, 0, 1, 1], [], []>} : vector<16x128xf32>, vector<128x128xf32>, vector<16x128xf32> -> vector<16x128xf32>
    %c0_8 = arith.constant 0 : index
    %c0_9 = arith.constant 0 : index
    %9 = vector.load %arg5[%c0_8, %c0_9] : memref<16x128xf32, #tpu.memory_space<vmem>>, vector<16x128xf32>
    tpu.vector_store %arg5[%c0_8, %c0_9], %8 {strides = array<i32>} : memref<16x128xf32, #tpu.memory_space<vmem>>, vector<16x128xf32>,
    return
  }
  func.func @transform_0(%arg0: i32) -> (i32, i32) {
    %c0_i32 = arith.constant 0 : i32
    %c0_i32_0 = arith.constant 0 : i32
    return %arg0, %c0_i32 : i32, i32
  }
  func.func @transform_1(%arg0: i32) -> (i32, i32) {
    %c0_i32 = arith.constant 0 : i32
    %c0_i32_0 = arith.constant 0 : i32
    return %arg0, %c0_i32 : i32, i32
  }
  func.func @transform_2(%arg0: i32) -> (i32, i32) {
    %c0_i32 = arith.constant 0 : i32
    %c0_i32_0 = arith.constant 0 : i32
    %c0_i32_1 = arith.constant 0 : i32
    return %c0_i32, %c0_i32_0 : i32, i32
  }
  func.func @transform_3(%arg0: i32) -> (i32, i32) {
    %c0_i32 = arith.constant 0 : i32
    %c0_i32_0 = arith.constant 0 : i32
    %c0_i32_1 = arith.constant 0 : i32
    return %c0_i32, %c0_i32_0 : i32, i32
  }
  func.func @transform_4(%arg0: i32) -> (i32, i32) {
    %c0_i32 = arith.constant 0 : i32
    %c0_i32_0 = arith.constant 0 : i32
    return %arg0, %c0_i32 : i32, i32
  }
}

</mosaic_0001>

<bundles_post_ra>
// kernel: bert_classifier_reg_forward.1
= control target key start
LH: loop header
LB: loop body
LE: loop exit
PB: predicated region body
PF: predicated region fallthrough
CT: control target
= control target key end

     0   :  { %s698_s15 = smov 0   ;;  %s749_s0 = inlined_call_operand.vmem [shape: bf16[512,128], index: 0, kind: input, shape index: {}]   ;;  %s750_s1 = inlined_call_operand.vmem [shape: f32[64,128], index: 1, kind: input, shape index: {}]   ;;  %s751_s2 = inlined_call_operand.vmem [shape: bf16[128,128], index: 2, kind: input, shape index: {}]   ;;  %s752_s3 = inlined_call_operand.vmem [shape: f32[1,128], index: 3, kind: input, shape index: {}]   ;;  %s753_s4 = inlined_call_operand.vmem [shape: f32[64,128], index: 4, kind: output, shape index: {}]  }
   0x1 LB: > { %s515_s16 = sadd.s32 4294967295, %s671_s15   ;;  %p519_p0 = scmp.ge.s32.totalorder %s671_s15, 1  ;;  %s671_s15 = sphi %s698_s15, %s14_s15  }
   0x2   : > { %p174_p1 = scmp.lt.s32.totalorder %s671_s15, 5 }
   0x4   : > { %p175_p2 = pnand %p519_p0, %p174_p1 }
   0x5   : > { %s520_s25 = sshll.u32 (!%p175_p2), %s515_s16, 4  ;;  %s522_s14 = sshll.u32 (!%p175_p2), %s515_s16, 1 }
   0x6   : > { %178 = sbr.rel (%p175_p2) target bundleno = 390 (0x186), region = 36  ;;  %p206_p3 = scmp.lt.s32.totalorder (!%p175_p2), %s520_s25, 63 }
   0x7   : > { %p212_p4 = scmp.lt.s32.totalorder (!%p175_p2), %s522_s14, 7 }
   0xb   : > { %v607_v0 = vld [vmem:[%s751_s2 + $0x38] sm:$0xff]  ;;  %v606_v1 = vld [vmem:[%s751_s2 + $0x30] sm:$0xff]  ;;  %v605_v2 = vld [vmem:[%s751_s2 + $0x28] sm:$0xff]  ;;  %s755_s25 = smov (!%p206_p3, %s520_s25), 63  ;;  %s757_s14 = smov (!%p212_p4, %s522_s14), 7 }
   0xc   : > { %609 = vmatpush.bf16.msra.mxu3 %v607_v0  ;;  %608 = vmatpush.bf16.msra.mxu2 %v607_v0  ;;  %v604_v3 = vld [vmem:[%s751_s2 + $0x20] sm:$0xff]  ;;  %v603_v4 = vld [vmem:[%s751_s2 + $0x18] sm:$0xff]  ;;  %v602_v5 = vld [vmem:[%s751_s2 + $0x10] sm:$0xff]  ;;  %s521_s6 = sshll.u32 %s755_s25, 2  ;;  %s523_s16 = sshll.u32 %s757_s14, 3 }
   0xd   : > { %355 = vmatpush.bf16.msra.mxu0 %v607_v0  ;;  %v601_v6 = vld [vmem:[%s751_s2 + $0x8] sm:$0xff]  ;;  %v600_v7 = vld [vmem:[%s751_s2] sm:$0xff]  ;;  %s209_s11 = scalar_lea.vmem %s749_s0, %s521_s6  ;;  %s215_s19 = scalar_lea.vmem %s750_s1, %s523_s16 }
   0xe   : > { %v597_v8 = vld [vmem:[%s209_s11 + $0x28] sm:$0xff]  ;;  %v594_v9 = vld [vmem:[%s209_s11 + $0x10] sm:$0xff]  ;;  %v592_v10 = vld [vmem:[%s209_s11] sm:$0xff]  ;;  %s221_s22 = scalar_lea.vmem %s753_s4, %s523_s16 }
   0xf   : > { %v598_v11 = vld [vmem:[%s209_s11 + $0x30] sm:$0xff]  ;;  %v595_v12 = vld [vmem:[%s209_s11 + $0x18] sm:$0xff]  ;;  %v593_v13 = vld [vmem:[%s209_s11 + $0x8] sm:$0xff] }
  0x10   : > { %611 = vmatpush.bf16.msra.mxu3 %v606_v1  ;;  %610 = vmatpush.bf16.msra.mxu2 %v606_v1  ;;  %v599_v14 = vld [vmem:[%s209_s11 + $0x38] sm:$0xff]  ;;  %v596_v15 = vld [vmem:[%s209_s11 + $0x20] sm:$0xff] }
  0x11   : > { %356 = vmatpush.bf16.msra.mxu0 %v606_v1  ;;  %v632_v27 = vld [vmem:[%s752_s3] ss:$0 sm:$0xff] }
  0x12   : > { %v420_v0 = vld [vmem:[%s215_s19] sm:$0xff] }
  0x14   : > { %613 = vmatpush.bf16.msra.mxu3 %v605_v2  ;;  %612 = vmatpush.bf16.msra.mxu2 %v605_v2 }
  0x15   : > { %357 = vmatpush.bf16.msra.mxu0 %v605_v2  ;;  %v421_v2 = vld [vmem:[%s215_s19 + $0x8] sm:$0xff] }
  0x18   : > { %615 = vmatpush.bf16.msra.mxu3 %v604_v3  ;;  %614 = vmatpush.bf16.msra.mxu2 %v604_v3 }
  0x19   : > { %358 = vmatpush.bf16.msra.mxu0 %v604_v3 }
  0x1c   : > { %617 = vmatpush.bf16.msra.mxu3 %v603_v4  ;;  %616 = vmatpush.bf16.msra.mxu2 %v603_v4 }
  0x1d   : > { %359 = vmatpush.bf16.msra.mxu0 %v603_v4 }
  0x20   : > { %619 = vmatpush.bf16.msra.mxu3 %v602_v5  ;;  %618 = vmatpush.bf16.msra.mxu2 %v602_v5 }
  0x21   : > { %360 = vmatpush.bf16.msra.mxu0 %v602_v5 }
  0x24   : > { %621 = vmatpush.bf16.msra.mxu3 %v601_v6  ;;  %620 = vmatpush.bf16.msra.mxu2 %v601_v6 }
  0x25   : > { %361 = vmatpush.bf16.msra.mxu0 %v601_v6 }
  0x28   : > { %623 = vmatpush.bf16.msra.mxu3 %v600_v7  ;;  %622 = vmatpush.bf16.msra.mxu2 %v600_v7 }
  0x29   : > { %362 = vmatpush.bf16.msra.mxu0 %v600_v7 }
  0x2b   : > { %388 = vmatmul.bf16.vlgmr.msra.gmra.mxu3 %v597_v8  ;;  %373 = vmatmul.bf16.vlgmr.msra.gmra.mxu2 %v594_v9 }
  0x2c   : > { %363 = vmatmul.bf16.vlgmr.msra.gmra.mxu0 %v592_v10 }
  0x3b   : > { %393 = vmatmul.bf16.gmra.mxu3 %v598_v11  ;;  %378 = vmatmul.bf16.gmra.mxu2 %v595_v12 }
  0x3c   : > { %368 = vmatmul.bf16.gmra.mxu0 %v593_v13 }
  0x4b   : > { %398 = vmatmul.bf16.gmra.mxu3 %v599_v14  ;;  %383 = vmatmul.bf16.gmra.mxu2 %v596_v15 }
  0xa9   : > { %v364_v24 = vpop.f32.mrf.mxu0 }
  0xaa   : > { %v365_v59 = vadd.f32 %v632_v27, %v364_v24 }
  0xae   : > { %v389_v16 = vpop.f32.mrf.mxu3  ;;  %v374_v17 = vpop.f32.mrf.mxu2 }
  0xaf   : > { %v390_v37 = vadd.f32 %v632_v27, %v389_v16  ;;  %v375_v51 = vadd.f32 %v632_v27, %v374_v17 }
  0xb1   : > { %v366_v28 = vpop.f32.mrf.mxu0 }
  0xb2   : > { %v367_v57 = vadd.f32 %v632_v27, %v366_v28 }
  0xb6   : > { %v391_v18 = vpop.f32.mrf.mxu3  ;;  %v376_v19 = vpop.f32.mrf.mxu2 }
  0xb7   : > { %v392_v34 = vadd.f32 %v632_v27, %v391_v18  ;;  %v377_v48 = vadd.f32 %v632_v27, %v376_v19 }
  0xb9   : > { %v369_v38 = vpop.f32.mrf.mxu0 }
  0xba   : > { %v370_v55 = vadd.f32 %v632_v27, %v369_v38 }
  0xbe   : > { %v394_v20 = vpop.f32.mrf.mxu3  ;;  %v379_v21 = vpop.f32.mrf.mxu2 }
  0xbf   : > { %v395_v33 = vadd.f32 %v632_v27, %v394_v20  ;;  %v380_v46 = vadd.f32 %v632_v27, %v379_v21 }
  0xc1   : > { %v371_v49 = vpop.f32.mrf.mxu0 }
  0xc2   : > { %v372_v53 = vadd.f32 %v632_v27, %v371_v49 }
  0xc6   : > { %v396_v22 = vpop.f32.mrf.mxu3  ;;  %v381_v23 = vpop.f32.mrf.mxu2 }
  0xc7   : > { %v397_v32 = vadd.f32 %v632_v27, %v396_v22  ;;  %v382_v44 = vadd.f32 %v632_v27, %v381_v23 }
  0xce   : > { %v399_v25 = vpop.f32.mrf.mxu3  ;;  %v384_v26 = vpop.f32.mrf.mxu2 }
  0xcf   : > { %v400_v30 = vadd.f32 %v632_v27, %v399_v25  ;;  %v385_v42 = vadd.f32 %v632_v27, %v384_v26 }
  0xd6   : > { %v401_v29 = vpop.f32.mrf.mxu3  ;;  %v386_v35 = vpop.f32.mrf.mxu2 }
  0xd7   : > { %v402_v31 = vadd.f32 %v632_v27, %v401_v29  ;;  %v387_v40 = vadd.f32 %v632_v27, %v386_v35 }
  0xd9   : > { %633 = vtanh.f32 %v402_v31 }
  0xda   : > { %635 = vtanh.f32 %v400_v30 }
  0xdb   : > { %637 = vtanh.f32 %v397_v32 }
  0xdc   : > { %639 = vtanh.f32 %v395_v33 }
  0xdd   : > { %641 = vtanh.f32 %v392_v34 }
  0xde   : > { %643 = vtanh.f32 %v390_v37 }
  0xdf   : > { %v634_v36 = vpop.eup %633  ;;  %645 = vtanh.f32 %v387_v40 }
  0xe0   : > { %422 = vmatpush.msra.mxu1 %v634_v36  ;;  %v636_v39 = vpop.eup %635  ;;  %647 = vtanh.f32 %v385_v42 }
  0xe1   : > { %v638_v41 = vpop.eup %637  ;;  %649 = vtanh.f32 %v382_v44 }
  0xe2   : > { %423 = vmatpush.msra.mxu1 %v636_v39  ;;  %v640_v43 = vpop.eup %639  ;;  %651 = vtanh.f32 %v380_v46 }
  0xe3   : > { %v642_v45 = vpop.eup %641  ;;  %653 = vtanh.f32 %v377_v48 }
  0xe4   : > { %424 = vmatpush.msra.mxu1 %v638_v41  ;;  %v644_v47 = vpop.eup %643  ;;  %655 = vtanh.f32 %v375_v51 }
  0xe5   : > { %v646_v50 = vpop.eup %645  ;;  %657 = vtanh.f32 %v372_v53 }
  0xe6   : > { %425 = vmatpush.msra.mxu1 %v640_v43  ;;  %v648_v52 = vpop.eup %647  ;;  %659 = vtanh.f32 %v370_v55 }
  0xe7   : > { %v650_v54 = vpop.eup %649  ;;  %661 = vtanh.f32 %v367_v57 }
  0xe8   : > { %426 = vmatpush.msra.mxu1 %v642_v45  ;;  %v652_v56 = vpop.eup %651  ;;  %663 = vtanh.f32 %v365_v59 }
  0xe9   : > { %v654_v58 = vpop.eup %653 }
  0xea   : > { %427 = vmatpush.msra.mxu1 %v644_v47  ;;  %v656_v60 = vpop.eup %655 }
  0xeb   : > { %v658_v61 = vpop.eup %657 }
  0xec   : > { %428 = vmatpush.msra.mxu1 %v646_v50  ;;  %v660_v62 = vpop.eup %659 }
  0xed   : > { %v662_v63 = vpop.eup %661 }
  0xee   : > { %429 = vmatpush.msra.mxu1 %v648_v52  ;;  %v664_v1 = vpop.eup %663 }
  0xf0   : > { %430 = vmatpush.msra.mxu1 %v650_v54 }
  0xf2   : > { %431 = vmatpush.msra.mxu1 %v652_v56 }
  0xf4   : > { %432 = vmatpush.msra.mxu1 %v654_v58 }
  0xf6   : > { %433 = vmatpush.msra.mxu1 %v656_v60 }
  0xf8   : > { %434 = vmatpush.msra.mxu1 %v658_v61 }
  0xfa   : > { %435 = vmatpush.msra.mxu1 %v660_v62 }
  0xfc   : > { %436 = vmatpush.msra.mxu1 %v662_v63 }
  0xfe   : > { %437 = vmatpush.msra.mxu1 %v664_v1 }
  0xff   : > { %438 = vmatmul.f32.vlgmr.msra.gmra.mxu1 %v420_v0 }
 0x107   : > { %441 = vmatmul.f32.gmra.mxu1 %v421_v2 }
 0x17c   : > { %v439_v3 = vpop.f32.mrf.mxu1 }
 0x17d   : > { %445 = vst [vmem:[%s221_s22] sm:$0xff] %v439_v3 }
 0x184   : > { %v442_v4 = vpop.f32.mrf.mxu1 }
 0x185   : > { %446 = vst [vmem:[%s221_s22 + $0x8] sm:$0xff] %v442_v4 }
 0x186 PF: > { %s14_s15 = sadd.s32 1, %s671_s15  }
 0x187   : > { %p11_p5 = scmp.ge.s32.totalorder %s14_s15, 6  }
 0x189   :  { %13 = sbr.rel (!%p11_p5) target bundleno = 1 (0x1), region = 69 }

</bundles_post_ra>
